<compile_context>
chip_gen: v7x
topology: tpu7x:2x2x1
jax: 0.10.0
libtpu: 0.0.40
codegen_flags: <defaults>
</compile_context>

<pallas_src>
import jax
import jax.numpy as jnp
from jax import lax
from jax.experimental import pallas as pl
from jax.experimental.pallas import tpu as pltpu


TILE_B_MAX = 512      # batch rows per grid step (MXU/sublane aligned)
LANE = 128            # lane width / hidden padding target


def _round_up(n, m):
    return (n + m - 1) // m * m


def _pick_tile_b(batch):
    return min(TILE_B_MAX, _round_up(batch, 8))


def _vmem_limit_bytes(tile_b, d, hp, n_io_tiles):
    """Right-size the scoped-VMEM request from actual tile sizes."""
    io_tiles = n_io_tiles * tile_b * d * 4          # f32 x / recon tiles
    weights = 2 * (d * hp * 2) + (hp + d) * 4       # bf16 W_e/W_d + f32 biases
    partial = d * 4                                 # per-tile partial-sum row
    need = 2 * (io_tiles + weights + partial)       # double-buffered
    need += tile_b * (hp + d) * 4                   # h / diff compute slack
    return int(min(need + (8 << 20), 40 << 20))     # headroom, <= 40 MiB


# ---------------------------------------------------------------------------
# Pallas kernels
# ---------------------------------------------------------------------------

def _make_fused_kernel(batch, tile_b, d, with_recon):
    """Fused encode + decode (+ optional recon store) + per-tile MSE partials."""
    ragged = (batch % tile_b) != 0

    def kernel(x_ref, we_ref, be_ref, wd_ref, bd_ref, *out_refs):
        if with_recon:
            recon_ref, part_ref = out_refs
        else:
            (part_ref,) = out_refs

        i = pl.program_id(0)
        x = x_ref[...]                                          # (TB, D) f32

        # encode: bf16 operands, f32 MXU accumulation; f32 bias add
        h = jnp.dot(x.astype(jnp.bfloat16), we_ref[...],
                    preferred_element_type=jnp.float32) + be_ref[...]
        # decode
        r = jnp.dot(h.astype(jnp.bfloat16), wd_ref[...],
                    preferred_element_type=jnp.float32) + bd_ref[...]

        if with_recon:
            recon_ref[...] = r.astype(recon_ref.dtype)

        sq = (x - r) * (x - r)                                  # (TB, D) f32
        if ragged:
            # Mask rows past the true batch (ragged last tile reads are
            # unspecified; jnp.where is NaN-safe, a multiply would not be).
            rows = lax.broadcasted_iota(jnp.int32, (tile_b, 1), 0) + i * tile_b
            sq = jnp.where(rows < batch, sq, 0.0)

        # Per-tile, per-lane partial sums (sublane reduce only; lane reduce
        # and the divide happen outside the kernel in plain JAX).
        part_ref[...] = jnp.sum(sq, axis=0, keepdims=True).reshape(1, 1, d)

    return kernel


def _make_mse_kernel(batch, tile_b, d):
    """Standalone tiled MSE: per-tile per-lane partial sums."""
    ragged = (batch % tile_b) != 0

    def kernel(x_ref, r_ref, part_ref):
        i = pl.program_id(0)
        diff = x_ref[...].astype(jnp.float32) - r_ref[...].astype(jnp.float32)
        sq = diff * diff
        if ragged:
            rows = lax.broadcasted_iota(jnp.int32, (tile_b, 1), 0) + i * tile_b
            sq = jnp.where(rows < batch, sq, 0.0)
        part_ref[...] = jnp.sum(sq, axis=0, keepdims=True).reshape(1, 1, d)

    return kernel


# ---------------------------------------------------------------------------
# Python wrappers
# ---------------------------------------------------------------------------

def ae_forward_with_loss(x_nchw, w_enc, b_enc, w_dec, b_dec, *, with_recon=True):
    """Fused forward + recon loss.

    Returns (recons_nchw, {'recon_loss': scalar}); recons is None when
    with_recon=False (loss-only path skips the recon HBM store, ~2x less
    traffic for training loops that only need the loss).
    """
    B, C, H, W = x_nchw.shape
    D = C * H * W
    Hid = w_enc.shape[1]
    HP = max(_round_up(Hid, LANE), LANE)          # pad hidden to 128 lanes only

    tile_b = _pick_tile_b(B)
    nb = (B + tile_b - 1) // tile_b

    x_flat = x_nchw.reshape(B, D).astype(jnp.float32)   # view-style reshape

    # bf16 weights (zero-padded hidden dim -> exact math), f32 biases.
    we = jnp.zeros((D, HP), jnp.bfloat16).at[:, :Hid].set(
        w_enc.astype(jnp.bfloat16))
    be = jnp.zeros((1, HP), jnp.float32).at[:, :Hid].set(
        b_enc.reshape(1, Hid).astype(jnp.float32))
    wd = jnp.zeros((HP, D), jnp.bfloat16).at[:Hid, :].set(
        w_dec.astype(jnp.bfloat16))
    bd = b_dec.reshape(1, D).astype(jnp.float32)

    kernel = _make_fused_kernel(B, tile_b, D, with_recon)

    part_shape = jax.ShapeDtypeStruct((nb, 1, D), jnp.float32)
    part_spec = pl.BlockSpec((1, 1, D), lambda i: (i, 0, 0))

    in_specs = [
        pl.BlockSpec((tile_b, D), lambda i: (i, 0)),   # x tile
        pl.BlockSpec((D, HP), lambda i: (0, 0)),       # W_e (resident)
        pl.BlockSpec((1, HP), lambda i: (0, 0)),       # b_e (resident)
        pl.BlockSpec((HP, D), lambda i: (0, 0)),       # W_d (resident)
        pl.BlockSpec((1, D), lambda i: (0, 0)),        # b_d (resident)
    ]

    compiler_params = pltpu.CompilerParams(
        # No cross-step accumulator -> batch axis is truly parallel
        # (lets v7x shard grid steps across its two TensorCores).
        dimension_semantics=("parallel",),
        vmem_limit_bytes=_vmem_limit_bytes(tile_b, D, HP,
                                           n_io_tiles=2 if with_recon else 1),
    )

    if with_recon:
        recon_flat, partials = pl.pallas_call(
            kernel,
            out_shape=(jax.ShapeDtypeStruct((B, D), x_nchw.dtype), part_shape),
            grid_spec=pltpu.PrefetchScalarGridSpec(
                num_scalar_prefetch=0,
                grid=(nb,),
                in_specs=in_specs,
                out_specs=(pl.BlockSpec((tile_b, D), lambda i: (i, 0)),
                           part_spec),
            ),
            compiler_params=compiler_params,
        )(x_flat, we, be, wd, bd)
        recons = recon_flat.reshape(B, C, H, W)
    else:
        partials = pl.pallas_call(
            kernel,
            out_shape=part_shape,
            grid_spec=pltpu.PrefetchScalarGridSpec(
                num_scalar_prefetch=0,
                grid=(nb,),
                in_specs=in_specs,
                out_specs=part_spec,
            ),
            compiler_params=compiler_params,
        )(x_flat, we, be, wd, bd)
        recons = None

    loss = jnp.sum(partials) / jnp.float32(B * D)
    return recons, {'recon_loss': loss}


def ae_forward(x_nchw, w_enc, b_enc, w_dec, b_dec):
    """Module `forward`: reconstruction only."""
    recons, _ = ae_forward_with_loss(x_nchw, w_enc, b_enc, w_dec, b_dec)
    return recons


def loss_function(inputs_nchw, recons_nchw):
    """BaseAE.loss_function API: standalone tiled MSE kernel (no host copies)."""
    B = inputs_nchw.shape[0]
    D = inputs_nchw.size // B
    x_flat = inputs_nchw.reshape(B, D)
    r_flat = recons_nchw.reshape(B, D)

    tile_b = _pick_tile_b(B)
    nb = (B + tile_b - 1) // tile_b

    partials = pl.pallas_call(
        _make_mse_kernel(B, tile_b, D),
        out_shape=jax.ShapeDtypeStruct((nb, 1, D), jnp.float32),
        grid_spec=pltpu.PrefetchScalarGridSpec(
            num_scalar_prefetch=0,
            grid=(nb,),
            in_specs=[
                pl.BlockSpec((tile_b, D), lambda i: (i, 0)),
                pl.BlockSpec((tile_b, D), lambda i: (i, 0)),
            ],
            out_specs=pl.BlockSpec((1, 1, D), lambda i: (i, 0, 0)),
        ),
        compiler_params=pltpu.CompilerParams(
            dimension_semantics=("parallel",),
            vmem_limit_bytes=_vmem_limit_bytes(tile_b, D, LANE, n_io_tiles=2),
        ),
    )(x_flat, r_flat)

    return {'recon_loss': jnp.sum(partials) / jnp.float32(B * D)}


# ---------------------------------------------------------------------------
# Main
# ---------------------------------------------------------------------------

if __name__ == "__main__":
    key = jax.random.PRNGKey(0)
    k_x, k_we, k_wd = jax.random.split(key, 3)

    # Small shapes consistent with a conv-style AE input.
    B, C, H, W = 2, 4, 16, 16
    D = C * H * W          # 1024
    HIDDEN = 32

    x = jax.random.normal(k_x, (B, C, H, W), dtype=jnp.float32)

    # Deterministic parameter init (synthetic; no checkpoint load).
    w_enc = jax.random.normal(k_we, (D, HIDDEN), dtype=jnp.float32) * (1.0 / jnp.sqrt(D))
    b_enc = jnp.zeros((1, HIDDEN), dtype=jnp.float32)
    w_dec = jax.random.normal(k_wd, (HIDDEN, D), dtype=jnp.float32) * (1.0 / jnp.sqrt(HIDDEN))
    b_dec = jnp.zeros((1, D), dtype=jnp.float32)

    # Fused forward + loss via Pallas kernel.
    recons, loss_dict = ae_forward_with_loss(x, w_enc, b_enc, w_dec, b_dec)
    recons = jax.block_until_ready(recons)
    fused_loss = jax.block_until_ready(loss_dict['recon_loss'])
    assert recons.shape == x.shape and recons.dtype == x.dtype

    # Loss-only path (skips the recon HBM store).
    _, loss_only_dict = ae_forward_with_loss(x, w_enc, b_enc, w_dec, b_dec,
                                             with_recon=False)
    loss_only = jax.block_until_ready(loss_only_dict['recon_loss'])

    # Standalone BaseAE.loss_function on the kernel-produced reconstruction.
    standalone_loss = jax.block_until_ready(
        loss_function(x, recons)['recon_loss'])

    # Pure-JAX reference with matching bf16-operand / f32-accumulate math.
    x_flat = x.reshape(B, D)
    h_ref = jnp.dot(x_flat.astype(jnp.bfloat16), w_enc.astype(jnp.bfloat16),
                    preferred_element_type=jnp.float32) + b_enc
    r_ref = jnp.dot(h_ref.astype(jnp.bfloat16), w_dec.astype(jnp.bfloat16),
                    preferred_element_type=jnp.float32) + b_dec
    ref_loss = jnp.mean((x_flat - r_ref) ** 2)

    assert jnp.allclose(recons.reshape(B, D), r_ref, rtol=2e-2, atol=2e-2)
    assert jnp.allclose(fused_loss, ref_loss, rtol=2e-2, atol=2e-2)
    assert jnp.allclose(loss_only, fused_loss, rtol=1e-5, atol=1e-6)
    assert jnp.allclose(
        standalone_loss,
        jnp.mean((x_flat - recons.reshape(B, D)) ** 2),
        rtol=1e-4, atol=1e-5)

    print("KERNEL_OK")
</pallas_src>

<mosaic_0001>
module attributes {stable_mosaic.version = 11 : i64} {
  func.func @kernel(%arg0: i32, %arg1: memref<8x1024xf32, #tpu.memory_space<vmem>>, %arg2: memref<1024x128xbf16, #tpu.memory_space<vmem>>, %arg3: memref<1x128xf32, #tpu.memory_space<vmem>>, %arg4: memref<128x1024xbf16, #tpu.memory_space<vmem>>, %arg5: memref<1x1024xf32, #tpu.memory_space<vmem>>, %arg6: memref<8x1024xf32, #tpu.memory_space<vmem>>, %arg7: memref<1x1x1024xf32, #tpu.memory_space<vmem>>) attributes {dimension_semantics = [#tpu.dimension_semantics<parallel>], iteration_bounds = array<i64: 1>, scalar_prefetch = 0 : i64, scratch_operands = 0 : i64, tpu.core_type = #tpu.core_type<tc>, window_params = [{transform_indices = @transform_0, window_bounds = array<i64: 8, 1024>}, {pipeline_mode = #tpu.pipeline_mode<synchronous>, transform_indices = @transform_1, window_bounds = array<i64: 1024, 128>}, {pipeline_mode = #tpu.pipeline_mode<synchronous>, transform_indices = @transform_2, window_bounds = array<i64: 1, 128>}, {pipeline_mode = #tpu.pipeline_mode<synchronous>, transform_indices = @transform_3, window_bounds = array<i64: 128, 1024>}, {pipeline_mode = #tpu.pipeline_mode<synchronous>, transform_indices = @transform_4, window_bounds = array<i64: 1, 1024>}, {transform_indices = @transform_5, window_bounds = array<i64: 8, 1024>}, {transform_indices = @transform_6, window_bounds = array<i64: 1, 1, 1024>}]} {
    %c0 = arith.constant 0 : index
    %c0_0 = arith.constant 0 : index
    %0 = vector.load %arg1[%c0, %c0_0] : memref<8x1024xf32, #tpu.memory_space<vmem>>, vector<8x1024xf32>
    %1 = arith.truncf %0 : vector<8x1024xf32> to vector<8x1024xbf16>
    %c0_1 = arith.constant 0 : index
    %c0_2 = arith.constant 0 : index
    %2 = vector.load %arg2[%c0_1, %c0_2] : memref<1024x128xbf16, #tpu.memory_space<vmem>>, vector<1024x128xbf16>
    %cst = arith.constant dense<0.000000e+00> : vector<8x128xf32>
    %3 = tpu.matmul %1, %2, %cst {dimension_numbers = #tpu.dot_dimension_numbers<[1], [0], [0], [1], [0, 0, 1, 1], [], []>} : vector<8x1024xbf16>, vector<1024x128xbf16>, vector<8x128xf32> -> vector<8x128xf32>
    %c0_3 = arith.constant 0 : index
    %c0_4 = arith.constant 0 : index
    %4 = vector.load %arg3[%c0_3, %c0_4] : memref<1x128xf32, #tpu.memory_space<vmem>>, vector<1x128xf32>
    %5 = vector.broadcast %4 : vector<1x128xf32> to vector<8x128xf32>
    %6 = arith.addf %3, %5 : vector<8x128xf32>
    %7 = arith.truncf %6 : vector<8x128xf32> to vector<8x128xbf16>
    %c0_5 = arith.constant 0 : index
    %c0_6 = arith.constant 0 : index
    %8 = vector.load %arg4[%c0_5, %c0_6] : memref<128x1024xbf16, #tpu.memory_space<vmem>>, vector<128x1024xbf16>
    %cst_7 = arith.constant dense<0.000000e+00> : vector<8x1024xf32>
    %9 = tpu.matmul %7, %8, %cst_7 {dimension_numbers = #tpu.dot_dimension_numbers<[1], [0], [0], [1], [0, 0, 1, 1], [], []>} : vector<8x128xbf16>, vector<128x1024xbf16>, vector<8x1024xf32> -> vector<8x1024xf32>
    %c0_8 = arith.constant 0 : index
    %c0_9 = arith.constant 0 : index
    %10 = vector.load %arg5[%c0_8, %c0_9] : memref<1x1024xf32, #tpu.memory_space<vmem>>, vector<1x1024xf32>
    %11 = vector.broadcast %10 : vector<1x1024xf32> to vector<8x1024xf32>
    %12 = arith.addf %9, %11 : vector<8x1024xf32>
    %c0_10 = arith.constant 0 : index
    %c0_11 = arith.constant 0 : index
    %13 = vector.load %arg6[%c0_10, %c0_11] : memref<8x1024xf32, #tpu.memory_space<vmem>>, vector<8x1024xf32>
    tpu.vector_store %arg6[%c0_10, %c0_11], %12 {strides = array<i32>} : memref<8x1024xf32, #tpu.memory_space<vmem>>, vector<8x1024xf32>,
    %14 = arith.subf %0, %12 : vector<8x1024xf32>
    %15 = arith.subf %0, %12 : vector<8x1024xf32>
    %16 = arith.mulf %14, %15 : vector<8x1024xf32>
    %17 = tpu.iota {dimensions = array<i32: 0>} : vector<8x1xi32>
    %c8_i32 = arith.constant 8 : i32
    %18 = arith.muli %arg0, %c8_i32 : i32
    %19 = vector.broadcast %18 : i32 to vector<8x1xi32>
    %20 = arith.addi %17, %19 : vector<8x1xi32>
    %c2_i32 = arith.constant 2 : i32
    %21 = vector.broadcast %c2_i32 : i32 to vector<8x1xi32>
    %22 = arith.cmpi slt, %20, %21 : vector<8x1xi32>
    %cst_12 = arith.constant 0.000000e+00 : f32
    %23 = vector.shape_cast %22 : vector<8x1xi1> to vector<8x1xi1>
    %24 = vector.broadcast %23 : vector<8x1xi1> to vector<8x1024xi1>
    %25 = vector.broadcast %cst_12 : f32 to vector<8x1024xf32>
    %26 = arith.select %24, %16, %25 : vector<8x1024xi1>, vector<8x1024xf32>
    %cst_13 = arith.constant dense<0.000000e+00> : vector<1024xf32>
    %27 = vector.multi_reduction <add>, %26, %cst_13 [0] : vector<8x1024xf32> to vector<1024xf32>
    %28 = vector.shape_cast %27 : vector<1024xf32> to vector<1x1024xf32>
    %29 = vector.shape_cast %28 : vector<1x1024xf32> to vector<1x1x1024xf32>
    %c0_14 = arith.constant 0 : index
    %c0_15 = arith.constant 0 : index
    %c0_16 = arith.constant 0 : index
    %30 = vector.load %arg7[%c0_14, %c0_15, %c0_16] : memref<1x1x1024xf32, #tpu.memory_space<vmem>>, vector<1x1x1024xf32>
    tpu.vector_store %arg7[%c0_14, %c0_15, %c0_16], %29 {strides = array<i32>} : memref<1x1x1024xf32, #tpu.memory_space<vmem>>, vector<1x1x1024xf32>,
    return
  }
  func.func @transform_0(%arg0: i32) -> (i32, i32) {
    %c0_i32 = arith.constant 0 : i32
    %c0_i32_0 = arith.constant 0 : i32
    return %arg0, %c0_i32 : i32, i32
  }
  func.func @transform_1(%arg0: i32) -> (i32, i32) {
    %c0_i32 = arith.constant 0 : i32
    %c0_i32_0 = arith.constant 0 : i32
    %c0_i32_1 = arith.constant 0 : i32
    return %c0_i32, %c0_i32_0 : i32, i32
  }
  func.func @transform_2(%arg0: i32) -> (i32, i32) {
    %c0_i32 = arith.constant 0 : i32
    %c0_i32_0 = arith.constant 0 : i32
    %c0_i32_1 = arith.constant 0 : i32
    return %c0_i32, %c0_i32_0 : i32, i32
  }
  func.func @transform_3(%arg0: i32) -> (i32, i32) {
    %c0_i32 = arith.constant 0 : i32
    %c0_i32_0 = arith.constant 0 : i32
    %c0_i32_1 = arith.constant 0 : i32
    return %c0_i32, %c0_i32_0 : i32, i32
  }
  func.func @transform_4(%arg0: i32) -> (i32, i32) {
    %c0_i32 = arith.constant 0 : i32
    %c0_i32_0 = arith.constant 0 : i32
    %c0_i32_1 = arith.constant 0 : i32
    return %c0_i32, %c0_i32_0 : i32, i32
  }
  func.func @transform_5(%arg0: i32) -> (i32, i32) {
    %c0_i32 = arith.constant 0 : i32
    %c0_i32_0 = arith.constant 0 : i32
    return %arg0, %c0_i32 : i32, i32
  }
  func.func @transform_6(%arg0: i32) -> (i32, i32, i32) {
    %c0_i32 = arith.constant 0 : i32
    %c0_i32_0 = arith.constant 0 : i32
    %c0_i32_1 = arith.constant 0 : i32
    return %arg0, %c0_i32, %c0_i32_0 : i32, i32, i32
  }
}

</mosaic_0001>

<bundles_post_ra>
// kernel: tpu_custom_call.1
= control target key start
LH: loop header
LB: loop body
LE: loop exit
PB: predicated region body
PF: predicated region fallthrough
CT: control target
= control target key end

     0   :  { %12 = vsyncpa [#allocation3], 0  ;;  %s2465_s0 = inlined_call_operand.hbm [shape: f32[2,1024], index: 0, kind: input, shape index: {}]   ;;  %s2466_s1 = inlined_call_operand.hbm [shape: bf16[1024,128], index: 1, kind: input, shape index: {}]   ;;  %s2467_s2 = inlined_call_operand.vmem [shape: f32[1,128], index: 2, kind: input, shape index: {}]   ;;  %s2468_s3 = inlined_call_operand.hbm [shape: bf16[128,1024], index: 3, kind: input, shape index: {}]   ;;  %s2469_s4 = inlined_call_operand.vmem [shape: f32[1,1024], index: 4, kind: input, shape index: {}]   ;;  %s2470_s5 = inlined_call_operand.hbm [shape: f32[2,1024], index: 5, kind: output, shape index: {0}]   ;;  %s2471_s6 = inlined_call_operand.hbm [shape: f32[1,1,1024], index: 6, kind: output, shape index: {1}]  }
   0x1   :  { %13 = vsyncpa [#allocation6], 0 }
   0x2   :  { %14 = vsyncpa [#allocation4], 0 }
   0x3   :  { %15 = vsyncpa [#allocation10], 0 }
   0x4   :  { %20 = vsyncadd [#allocation3], 768  ;;  %s2216_s21 = smov [#allocation5]   ;;  %s2098_s25 = scalar_lea.hbm %s2466_s1, 8192 }
   0x5   :  { %s33_s22 = sshll.u32 %s2216_s21, 4  ;;  %p2099_p0 = scmp.ne.s32.totalorder %s2466_s1, %s2098_s25  ;;  %s34_s22 = int_to_ptr.vmem [resolvable:$true] %s33_s22 }
   0x6   :  { %p2102_p1 = scmp.lt.u32.totalorder %s2098_s25, %s2466_s1 }
   0x8   :  { %p2104_p2 = pnand %p2102_p1, %p2099_p0 }
   0xa   :  { %2107 = shalt.err (!%p2104_p2)
}
   0xb   :  { %s2108_s30 = scalar_lea.vmem %s34_s22, 8192  ;;  %p2113_p4 = scmp.lt.s32.totalorder %s34_s22, %s34_s22 }
   0xc   :  { %p2109_p3 = scmp.ne.s32.totalorder %s34_s22, %s2108_s30  ;;  %p2114_p5 = scmp.lt.s32.totalorder %s2108_s30, %s2108_s30 }
   0xe   :  { %p2115_p6 = por %p2114_p5, %p2113_p4 }
  0x10   :  { %p2116_p7 = pnand %p2115_p6, %p2109_p3 }
  0x12   :  { %2119 = shalt.err (!%p2116_p7)
}
  0x13   :  { %s2217_s7 = smov 64   ;;  %s2218_s8 = smov 4  }
  0x14   :  { %39 = dma.hbm_to_vmem [thread:$0]  %s2466_s1, 8192, %s34_s22, [#allocation6], %s2217_s7, %s2217_s7, %s2218_s8  }
  0x15   :  { %s2219_s11 = smov [#allocation2]   ;;  %s2120_s15 = scalar_lea.hbm %s2465_s0, 256 }
  0x16   :  { %s21_s12 = sshll.u32 %s2219_s11, 4  ;;  %p2121_p8 = scmp.ne.s32.totalorder %s2465_s0, %s2120_s15  ;;  %s22_s12 = int_to_ptr.vmem [resolvable:$true] %s21_s12 }
  0x17   :  { %p2124_p9 = scmp.lt.u32.totalorder %s2120_s15, %s2465_s0 }
  0x19   :  { %p2126_p10 = pnand %p2124_p9, %p2121_p8 }
  0x1b   :  { %2129 = shalt.err (!%p2126_p10)
}
  0x1c   :  { %s2130_s20 = scalar_lea.vmem %s22_s12, 256  ;;  %s2134_s1 = scalar_lea.vmem %s22_s12, 1024 }
  0x1d   :  { %p2131_p11 = scmp.ne.s32.totalorder %s22_s12, %s2130_s20  ;;  %p2135_p12 = scmp.lt.s32.totalorder %s22_s12, %s22_s12 }
  0x1e   :  { %p2136_p13 = scmp.lt.s32.totalorder %s2134_s1, %s2130_s20 }
  0x20   :  { %p2137_p0 = por %p2136_p13, %p2135_p12 }
  0x22   :  { %p2138_p1 = pnand %p2137_p0, %p2131_p11 }
  0x24   :  { %2141 = shalt.err (!%p2138_p1)
}
  0x25   :  { %s2220_s21 = smov 256   ;;  %s2221_s22 = smov 16  }
  0x26   :  { %27 = dma.hbm_to_vmem [thread:$0]  %s2465_s0, 256, %s22_s12, [#allocation3], %s2220_s21, %s2220_s21, %s2221_s22  }
  0x27   :  { %s2222_s25 = smov [#allocation7]   ;;  %s2142_s29 = scalar_lea.hbm %s2468_s3, 8192 }
  0x28   :  { %s47_s26 = sshll.u32 %s2222_s25, 4  ;;  %p2143_p2 = scmp.ne.s32.totalorder %s2468_s3, %s2142_s29  ;;  %s48_s26 = int_to_ptr.vmem [resolvable:$true] %s47_s26 }
  0x29   :  { %p2146_p3 = scmp.lt.u32.totalorder %s2142_s29, %s2468_s3 }
  0x2b   :  { %p2148_p4 = pnand %p2146_p3, %p2143_p2 }
  0x2d   :  { %2151 = shalt.err (!%p2148_p4)
}
  0x2e   :  { %s2152_s10 = scalar_lea.vmem %s48_s26, 8192  ;;  %p2157_p6 = scmp.lt.s32.totalorder %s48_s26, %s48_s26 }
  0x2f   :  { %p2153_p5 = scmp.ne.s32.totalorder %s48_s26, %s2152_s10  ;;  %p2158_p7 = scmp.lt.s32.totalorder %s2152_s10, %s2152_s10 }
  0x31   :  { %p2159_p8 = por %p2158_p7, %p2157_p6 }
  0x33   :  { %p2160_p9 = pnand %p2159_p8, %p2153_p5 }
  0x35   :  { %2163 = shalt.err (!%p2160_p9)
}
  0x36   :  { %s2223_s0 = smov 512   ;;  %s2224_s11 = smov 32  }
  0x37   :  { %53 = dma.hbm_to_vmem [thread:$0]  %s2468_s3, 8192, %s48_s26, [#allocation6], %s2223_s0, %s2223_s0, %s2224_s11  }
  0x38   :  { %2208 = dma.done.wait [#allocation3], 1024  }
  0x39   :  { %2209 = vsyncadd [#allocation3], 4294966272 }
  0x3a   :  { %2210 = dma.done.wait [#allocation6], 16384  }
  0x3b   :  { %2211 = vsyncadd [#allocation6], 4294950912  ;;  %v2026_v0 = vld [vmem:[#allocation5 + $0x40] sm:$0xff]   ;;  %v2030_v4 = vld [vmem:[#allocation5 + $0x48] sm:$0xff]   ;;  %v2225_v24 = vmov 1983009808   ;;  %v89_v26 = vlaneseq }
  0x3c   :  { %v2027_v1 = vld [vmem:[#allocation5 + $0xc0] sm:$0xff]   ;;  %1924 = vmatprep.subr.bf16.mxu0 %v2026_v0  ;;  %v2031_v5 = vld [vmem:[#allocation5 + $0xc8] sm:$0xff]   ;;  %v2034_v8 = vld [vmem:[#allocation5 + $0x50] sm:$0xff]   ;;  %v87_v25 = vunpack.c.l.s4 %v2225_v24 }
  0x3d   :  { %v2028_v2 = vld [vmem:[#allocation5] sm:$0xff]   ;;  %1946 = vmatprep.subr.bf16.mxu1 %v2027_v1  ;;  %v2032_v6 = vld [vmem:[#allocation5 + $0x8] sm:$0xff]   ;;  %v2035_v9 = vld [vmem:[#allocation5 + $0xd0] sm:$0xff]   ;;  %v2304_v32 = vshrl.u32 %v89_v26, 7 }
  0x3e   :  { %v2029_v3 = vld [vmem:[#allocation5 + $0x80] sm:$0xff]   ;;  %1925 = vmatpush3.bf16.msra.mxu0 %v2028_v2  ;;  %v2033_v7 = vld [vmem:[#allocation5 + $0x88] sm:$0xff]   ;;  %v2036_v10 = vld [vmem:[#allocation5 + $0x10] sm:$0xff]   ;;  %v88_v31 = vunpack.c.0.s8 %v87_v25 }
  0x3f   :  { %1947 = vmatpush3.bf16.msra.mxu1 %v2029_v3  ;;  %1926 = vmatprep.subr.bf16.mxu0 %v2030_v4  ;;  %v2037_v11 = vld [vmem:[#allocation5 + $0x90] sm:$0xff]   ;;  %v2038_v12 = vld [vmem:[#allocation5 + $0x58] sm:$0xff]   ;;  %v2042_v16 = vld [vmem:[#allocation5 + $0x60] sm:$0xff]   ;;  %vm1557_vm0 = vcmp.lt.s32.totalorder %v2304_v32, 2 }
  0x40   :  { %1948 = vmatprep.subr.bf16.mxu1 %v2031_v5  ;;  %v2039_v13 = vld [vmem:[#allocation5 + $0xd8] sm:$0xff]   ;;  %v2043_v17 = vld [vmem:[#allocation5 + $0xe0] sm:$0xff]   ;;  %v2046_v20 = vld [vmem:[#allocation5 + $0x68] sm:$0xff]   ;;  %v2307_v37 = vsub.s32 %v88_v31, %v2304_v32 }
  0x41   :  { %v2040_v14 = vld [vmem:[#allocation5 + $0x18] sm:$0xff]   ;;  %v2044_v18 = vld [vmem:[#allocation5 + $0x20] sm:$0xff]   ;;  %v2047_v21 = vld [vmem:[#allocation5 + $0xe8] sm:$0xff]  }
  0x42   :  { %1927 = vmatpush3.bf16.msra.mxu0 %v2032_v6  ;;  %v2041_v15 = vld [vmem:[#allocation5 + $0x98] sm:$0xff]   ;;  %v2045_v19 = vld [vmem:[#allocation5 + $0xa0] sm:$0xff]   ;;  %v2048_v22 = vld [vmem:[#allocation5 + $0x28] sm:$0xff]  }
  0x43   :  { %1949 = vmatpush3.bf16.msra.mxu1 %v2033_v7  ;;  %1928 = vmatprep.subr.bf16.mxu0 %v2034_v8  ;;  %v2049_v23 = vld [vmem:[#allocation5 + $0xa8] sm:$0xff]   ;;  %v2050_v27 = vld [vmem:[#allocation5 + $0x70] sm:$0xff]   ;;  %v2054_v33 = vld [vmem:[#allocation5 + $0x78] sm:$0xff]  }
  0x44   :  { %1950 = vmatprep.subr.bf16.mxu1 %v2035_v9  ;;  %v2051_v28 = vld [vmem:[#allocation5 + $0xf0] sm:$0xff]   ;;  %v2055_v34 = vld [vmem:[#allocation5 + $0xf8] sm:$0xff]   ;;  %v2309_v38 = vld [vmem:[#allocation2] sm:$0xff] }
  0x45   :  { %v2052_v29 = vld [vmem:[#allocation5 + $0x30] sm:$0xff]   ;;  %v2056_v35 = vld [vmem:[#allocation5 + $0x38] sm:$0xff]   ;;  %v2313_v40 = vld [vmem:[#allocation2 + $0x20] sm:$0xff] }
  0x46   :  { %1929 = vmatpush3.bf16.msra.mxu0 %v2036_v10  ;;  %v2053_v30 = vld [vmem:[#allocation5 + $0xb0] sm:$0xff]   ;;  %v2057_v36 = vld [vmem:[#allocation5 + $0xb8] sm:$0xff]   ;;  %v2062_v46 = vld [vmem:[#allocation5 + $0x140] sm:$0xff]  }
  0x47   :  { %1951 = vmatpush3.bf16.msra.mxu1 %v2037_v11  ;;  %1930 = vmatprep.subr.bf16.mxu0 %v2038_v12  ;;  %v2311_v39 = vld [vmem:[#allocation2 + $0x10] sm:$0xff]  ;;  %v2063_v49 = vld [vmem:[#allocation5 + $0x1c0] sm:$0xff]   ;;  %v2066_v62 = vld [vmem:[#allocation5 + $0x148] sm:$0xff]  }
  0x48   :  { %1952 = vmatprep.subr.bf16.mxu1 %v2039_v13  ;;  %v2315_v41 = vld [vmem:[#allocation2 + $0x30] sm:$0xff]  ;;  %v82_v42 = vcombine.low %v2309_v38, %v2311_v39  ;;  %v83_v43 = vcombine.high %v2309_v38, %v2311_v39  ;;  %v2064_v56 = vld [vmem:[#allocation5 + $0x100] sm:$0xff]   ;;  %v2067_v63 = vld [vmem:[#allocation5 + $0x1c8] sm:$0xff]  }
  0x49   :  { %v84_v44 = vcombine.low %v2313_v40, %v2315_v41  ;;  %v85_v45 = vcombine.high %v2313_v40, %v2315_v41  ;;  %v2065_v57 = vld [vmem:[#allocation5 + $0x180] sm:$0xff]   ;;  %v2068_v0 = vld [vmem:[#allocation5 + $0x108] sm:$0xff]   ;;  %v2070_v2 = vld [vmem:[#allocation5 + $0x150] sm:$0xff]  }
  0x4a   :  { %1931 = vmatpush3.bf16.msra.mxu0 %v2040_v14  ;;  %v92_v47 = vrot.slane %v82_v42, %v2307_v37  ;;  %v99_v48 = vrot.slane %v83_v43, %v2307_v37  ;;  %v2069_v1 = vld [vmem:[#allocation5 + $0x188] sm:$0xff]   ;;  %v2071_v3 = vld [vmem:[#allocation5 + $0x1d0] sm:$0xff]   ;;  %v2074_v6 = vld [vmem:[#allocation5 + $0x158] sm:$0xff]  }
  0x4b   :  { %1953 = vmatpush3.bf16.msra.mxu1 %v2041_v15  ;;  %1932 = vmatprep.subr.bf16.mxu0 %v2042_v16  ;;  %v106_v50 = vrot.slane %v84_v44, %v2307_v37  ;;  %v113_v51 = vrot.slane %v85_v45, %v2307_v37  ;;  %v2072_v4 = vld [vmem:[#allocation5 + $0x110] sm:$0xff]   ;;  %v2075_v7 = vld [vmem:[#allocation5 + $0x1d8] sm:$0xff]   ;;  %v2078_v10 = vld [vmem:[#allocation5 + $0x160] sm:$0xff]  }
  0x4c   :  { %1954 = vmatprep.subr.bf16.mxu1 %v2043_v17  ;;  %v2073_v5 = vld [vmem:[#allocation5 + $0x190] sm:$0xff]   ;;  %v2076_v8 = vld [vmem:[#allocation5 + $0x118] sm:$0xff]   ;;  %v2079_v11 = vld [vmem:[#allocation5 + $0x1e0] sm:$0xff]  }
  0x4d   :  { %v115_v52 = vcombine.high %v92_v47, %v106_v50  ;;  %v117_v53 = vcombine.high %v99_v48, %v113_v51  ;;  %v114_v54 = vcombine.low %v92_v47, %v106_v50  ;;  %v116_v55 = vcombine.low %v99_v48, %v113_v51  ;;  %v2077_v9 = vld [vmem:[#allocation5 + $0x198] sm:$0xff]   ;;  %v2080_v12 = vld [vmem:[#allocation5 + $0x120] sm:$0xff]   ;;  %v2082_v14 = vld [vmem:[#allocation5 + $0x168] sm:$0xff]  }
  0x4e   :  { %1933 = vmatpush3.bf16.msra.mxu0 %v2044_v18  ;;  %v2081_v13 = vld [vmem:[#allocation5 + $0x1a0] sm:$0xff]   ;;  %v2083_v15 = vld [vmem:[#allocation5 + $0x1e8] sm:$0xff]   ;;  %v2086_v18 = vld [vmem:[#allocation5 + $0x170] sm:$0xff]  }
  0x4f   :  { %1955 = vmatpush3.bf16.msra.mxu1 %v2045_v19  ;;  %1934 = vmatprep.subr.bf16.mxu0 %v2046_v20  ;;  %v163_v58 = vpack.c.bf16 %v115_v52, %v115_v52  ;;  %v165_v59 = vpack.c.bf16 %v117_v53, %v117_v53  ;;  %v162_v60 = vpack.c.bf16 %v114_v54, %v114_v54  ;;  %v2084_v16 = vld [vmem:[#allocation5 + $0x128] sm:$0xff]   ;;  %v2087_v19 = vld [vmem:[#allocation5 + $0x1f0] sm:$0xff]   ;;  %v2331_v25 = vld [vmem:[#allocation2 + $0x18] sm:$0xff] }
  0x50   :  { %1956 = vmatprep.subr.bf16.mxu1 %v2047_v21  ;;  %v164_v61 = vpack.c.bf16 %v116_v55, %v116_v55  ;;  %v2085_v17 = vld [vmem:[#allocation5 + $0x1a8] sm:$0xff]   ;;  %v2088_v20 = vld [vmem:[#allocation5 + $0x130] sm:$0xff]   ;;  %v850_v52 = vld [vmem:[#allocation7] sm:$0xff] }
  0x51   :  { %721 = vmatprep.mubr.bf16.mxu0 %v163_v58  ;;  %761 = vmatprep.mubr.bf16.mxu1 %v165_v59  ;;  %v2089_v21 = vld [vmem:[#allocation5 + $0x1b0] sm:$0xff]   ;;  %v2329_v24 = vld [vmem:[#allocation2 + $0x8] sm:$0xff]  ;;  %v854_v53 = vld [vmem:[#allocation7 + $0x20] sm:$0xff] }
  0x52   :  { %1935 = vmatpush3.bf16.msra.mxu0 %v2048_v22  ;;  %v2090_v22 = vld [vmem:[#allocation5 + $0x178] sm:$0xff]   ;;  %v2333_v26 = vld [vmem:[#allocation2 + $0x28] sm:$0xff]  ;;  %v1860_v55 = vcombine.low %v850_v52, %v854_v53  ;;  %v858_v58 = vld [vmem:[#allocation7 + $0x40] sm:$0xff] }
  0x53   :  { %1957 = vmatpush3.bf16.msra.mxu1 %v2049_v23  ;;  %1936 = vmatprep.subr.bf16.mxu0 %v2050_v27  ;;  %v2091_v23 = vld [vmem:[#allocation5 + $0x1f8] sm:$0xff]   ;;  %v851_v54 = vld [vmem:[#allocation7 + $0x8] sm:$0xff]  ;;  %v862_v59 = vld [vmem:[#allocation7 + $0x60] sm:$0xff] }
  0x54   :  { %1958 = vmatprep.subr.bf16.mxu1 %v2051_v28  ;;  %v2335_v27 = vld [vmem:[#allocation2 + $0x38] sm:$0xff]  ;;  %v118_v28 = vcombine.low %v2329_v24, %v2331_v25 }
  0x55   :  { %v121_v31 = vcombine.high %v2333_v26, %v2335_v27 }
  0x56   :  { %1937 = vmatpush3.bf16.msra.mxu0 %v2052_v29  ;;  %v119_v29 = vcombine.high %v2329_v24, %v2331_v25 }
  0x57   :  { %1959 = vmatpush3.bf16.msra.mxu1 %v2053_v30  ;;  %1938 = vmatprep.subr.bf16.mxu0 %v2054_v33  ;;  %v120_v30 = vcombine.low %v2333_v26, %v2335_v27  ;;  %v2092_v33 = vld [vmem:[#allocation5 + $0x138] sm:$0xff]   ;;  %v149_v43 = vrot.slane %v121_v31, %v2307_v37  ;;  %v894_v31 = vld [vmem:[#allocation7 + $0x160] sm:$0xff] }
  0x58   :  { %1960 = vmatprep.subr.bf16.mxu1 %v2055_v34  ;;  %v2093_v34 = vld [vmem:[#allocation5 + $0x1b8] sm:$0xff]  }
  0x59   :  { %v142_v42 = vrot.slane %v120_v30, %v2307_v37  ;;  %v890_v30 = vld [vmem:[#allocation7 + $0x140] sm:$0xff] }
  0x5a   :  { %1939 = vmatpush3.bf16.msra.mxu0 %v2056_v35  ;;  %v128_v35 = vrot.slane %v118_v28, %v2307_v37 }
  0x5b   :  { %1961 = vmatpush3.bf16.msra.mxu1 %v2057_v36  ;;  %1968 = vmatprep.subr.bf16.mxu0 %v2062_v46  ;;  %v135_v36 = vrot.slane %v119_v29, %v2307_v37 }
  0x5c   :  { %1990 = vmatprep.subr.bf16.mxu1 %v2063_v49  ;;  %v151_v44 = vcombine.high %v128_v35, %v142_v42  ;;  %v150_v46 = vcombine.low %v128_v35, %v142_v42  ;;  %v1901_v42 = vcombine.high %v890_v30, %v894_v31 }
  0x5d   :  { %722 = vmatmul.mubr.bf16.vlgmr.msra.gmra.mrb[0].mxu0 %v162_v60  ;;  %v153_v45 = vcombine.high %v135_v36, %v149_v43  ;;  %v152_v47 = vcombine.low %v135_v36, %v149_v43 }
  0x5e   :  { %762 = vmatmul.mubr.bf16.vlgmr.msra.gmra.mrb[0].mxu1 %v164_v61  ;;  %1969 = vmatpush3.bf16.msra.mxu0 %v2064_v56  ;;  %v167_v48 = vpack.c.bf16 %v151_v44, %v151_v44  ;;  %v166_v50 = vpack.c.bf16 %v150_v46, %v150_v46  ;;  %v1861_v56 = vcombine.high %v850_v52, %v854_v53  ;;  %v898_v46 = vld [vmem:[#allocation7 + $0x180] sm:$0xff] }
  0x5f   :  { %1991 = vmatpush3.bf16.msra.mxu1 %v2065_v57  ;;  %1970 = vmatprep.subr.bf16.mxu0 %v2066_v62  ;;  %v169_v49 = vpack.c.bf16 %v153_v45, %v153_v45  ;;  %v168_v51 = vpack.c.bf16 %v152_v47, %v152_v47  ;;  %v855_v57 = vld [vmem:[#allocation7 + $0x28] sm:$0xff]  ;;  %v1869_v62 = vcombine.high %v858_v58, %v862_v59  ;;  %v902_v47 = vld [vmem:[#allocation7 + $0x1a0] sm:$0xff] }
  0x60   :  { %1992 = vmatprep.subr.bf16.mxu1 %v2067_v63  ;;  %801 = vmatprep.mubr.bf16.mxu0 %v167_v48  ;;  %v1862_v60 = vcombine.low %v851_v54, %v855_v57  ;;  %v1863_v61 = vcombine.high %v851_v54, %v855_v57  ;;  %v859_v63 = vld [vmem:[#allocation7 + $0x48] sm:$0xff]  ;;  %v1900_v44 = vcombine.low %v890_v30, %v894_v31  ;;  %v906_v54 = vld [vmem:[#allocation7 + $0x1c0] sm:$0xff] }
  0x61   :  { %841 = vmatprep.mubr.bf16.mxu1 %v169_v49  ;;  %v899_v48 = vld [vmem:[#allocation7 + $0x188] sm:$0xff]  ;;  %v1909_v49 = vcombine.high %v898_v46, %v902_v47 }
  0x62   :  { %1971 = vmatpush3.bf16.msra.mxu0 %v2068_v0  ;;  %v863_v0 = vld [vmem:[#allocation7 + $0x68] sm:$0xff] }
  0x63   :  { %1993 = vmatpush3.bf16.msra.mxu1 %v2069_v1  ;;  %1972 = vmatprep.subr.bf16.mxu0 %v2070_v2  ;;  %v866_v1 = vld [vmem:[#allocation7 + $0x80] sm:$0xff]  ;;  %v1871_v2 = vcombine.high %v859_v63, %v863_v0 }
  0x64   :  { %1994 = vmatprep.subr.bf16.mxu1 %v2071_v3  ;;  %v870_v3 = vld [vmem:[#allocation7 + $0xa0] sm:$0xff] }
  0x66   :  { %1973 = vmatpush3.bf16.msra.mxu0 %v2072_v4  ;;  %v867_v4 = vld [vmem:[#allocation7 + $0x88] sm:$0xff] }
  0x67   :  { %1995 = vmatpush3.bf16.msra.mxu1 %v2073_v5  ;;  %1974 = vmatprep.subr.bf16.mxu0 %v2074_v6  ;;  %v871_v5 = vld [vmem:[#allocation7 + $0xa8] sm:$0xff]  ;;  %v1868_v6 = vcombine.low %v858_v58, %v862_v59 }
  0x68   :  { %1996 = vmatprep.subr.bf16.mxu1 %v2075_v7  ;;  %v1870_v7 = vcombine.low %v859_v63, %v863_v0  ;;  %v911_v58 = vld [vmem:[#allocation7 + $0x1e8] sm:$0xff]  ;;  %v856_v63 = vld [vmem:[#allocation7 + $0x30] sm:$0xff]  ;;  %v853_v0 = vld [vmem:[#allocation7 + $0x18] sm:$0xff] }
  0x6a   :  { %1975 = vmatpush3.bf16.msra.mxu0 %v2076_v8  ;;  %v1877_v8 = vcombine.high %v866_v1, %v870_v3 }
  0x6b   :  { %1997 = vmatpush3.bf16.msra.mxu1 %v2077_v9  ;;  %1976 = vmatprep.subr.bf16.mxu0 %v2078_v10  ;;  %v1879_v9 = vcombine.high %v867_v4, %v871_v5  ;;  %v874_v10 = vld [vmem:[#allocation7 + $0xc0] sm:$0xff] }
  0x6c   :  { %1998 = vmatprep.subr.bf16.mxu1 %v2079_v11  ;;  %v878_v11 = vld [vmem:[#allocation7 + $0xe0] sm:$0xff] }
  0x6e   :  { %1977 = vmatpush3.bf16.msra.mxu0 %v2080_v12  ;;  %v875_v12 = vld [vmem:[#allocation7 + $0xc8] sm:$0xff] }
  0x6f   :  { %1999 = vmatpush3.bf16.msra.mxu1 %v2081_v13  ;;  %1978 = vmatprep.subr.bf16.mxu0 %v2082_v14  ;;  %v879_v13 = vld [vmem:[#allocation7 + $0xe8] sm:$0xff]  ;;  %v1876_v14 = vcombine.low %v866_v1, %v870_v3 }
  0x70   :  { %2000 = vmatprep.subr.bf16.mxu1 %v2083_v15  ;;  %v1878_v15 = vcombine.low %v867_v4, %v871_v5 }
  0x72   :  { %1979 = vmatpush3.bf16.msra.mxu0 %v2084_v16  ;;  %v1885_v16 = vcombine.high %v874_v10, %v878_v11 }
  0x73   :  { %2001 = vmatpush3.bf16.msra.mxu1 %v2085_v17  ;;  %1980 = vmatprep.subr.bf16.mxu0 %v2086_v18  ;;  %v1887_v17 = vcombine.high %v875_v12, %v879_v13  ;;  %v882_v18 = vld [vmem:[#allocation7 + $0x100] sm:$0xff] }
  0x74   :  { %2002 = vmatprep.subr.bf16.mxu1 %v2087_v19  ;;  %v886_v19 = vld [vmem:[#allocation7 + $0x120] sm:$0xff] }
  0x75   :  { %v1893_v28 = vcombine.high %v882_v18, %v886_v19  ;;  %v1892_v35 = vcombine.low %v882_v18, %v886_v19 }
  0x76   :  { %1981 = vmatpush3.bf16.msra.mxu0 %v2088_v20  ;;  %v883_v20 = vld [vmem:[#allocation7 + $0x108] sm:$0xff] }
  0x77   :  { %2003 = vmatpush3.bf16.msra.mxu1 %v2089_v21  ;;  %1982 = vmatprep.subr.bf16.mxu0 %v2090_v22  ;;  %v887_v21 = vld [vmem:[#allocation7 + $0x128] sm:$0xff]  ;;  %v1884_v22 = vcombine.low %v874_v10, %v878_v11 }
  0x78   :  { %2004 = vmatprep.subr.bf16.mxu1 %v2091_v23  ;;  %v1886_v23 = vcombine.low %v875_v12, %v879_v13  ;;  %v1895_v29 = vcombine.high %v883_v20, %v887_v21  ;;  %v1894_v36 = vcombine.low %v883_v20, %v887_v21 }
  0x7a   :  { %1983 = vmatpush3.bf16.msra.mxu0 %v2092_v33  ;;  %v891_v33 = vld [vmem:[#allocation7 + $0x148] sm:$0xff] }
  0x7b   :  { %2005 = vmatpush3.bf16.msra.mxu1 %v2093_v34  ;;  %1276 = vmatprep.subr.bf16.mxu0 %v1861_v56  ;;  %v895_v34 = vld [vmem:[#allocation7 + $0x168] sm:$0xff] }
  0x7c   :  { %1317 = vmatprep.subr.bf16.mxu1 %v1863_v61  ;;  %v1903_v43 = vcombine.high %v891_v33, %v895_v34  ;;  %v1902_v45 = vcombine.low %v891_v33, %v895_v34  ;;  %v907_v56 = vld [vmem:[#allocation7 + $0x1c8] sm:$0xff] }
  0x7d   :  { %802 = vmatmul.mubr.bf16.vlgmr.msra.gmra.mrb[4].mxu0 %v166_v50  ;;  %v903_v50 = vld [vmem:[#allocation7 + $0x1a8] sm:$0xff]  ;;  %v1919_v61 = vcombine.high %v907_v56, %v911_v58 }
  0x7e   :  { %842 = vmatmul.mubr.bf16.vlgmr.msra.gmra.mrb[4].mxu1 %v168_v51  ;;  %1277 = vmatpush1.bf16.msra.mxu0 %v1860_v55  ;;  %v1908_v51 = vcombine.low %v898_v46, %v902_v47  ;;  %v1910_v52 = vcombine.low %v899_v48, %v903_v50  ;;  %v1911_v53 = vcombine.high %v899_v48, %v903_v50  ;;  %v910_v55 = vld [vmem:[#allocation7 + $0x1e0] sm:$0xff]  ;;  %v872_v50 = vld [vmem:[#allocation7 + $0xb0] sm:$0xff] }
  0x7f   :  { %1318 = vmatpush1.bf16.msra.mxu1 %v1862_v60  ;;  %1278 = vmatprep.subr.bf16.mxu0 %v1869_v62  ;;  %v1917_v57 = vcombine.high %v906_v54, %v910_v55  ;;  %v1916_v59 = vcombine.low %v906_v54, %v910_v55  ;;  %v1918_v60 = vcombine.low %v907_v56, %v911_v58  ;;  %v852_v62 = vld [vmem:[#allocation7 + $0x10] sm:$0xff] }
  0x80   :  { %1319 = vmatprep.subr.bf16.mxu1 %v1871_v2  ;;  %v1865_v1 = vcombine.high %v852_v62, %v856_v63  ;;  %v857_v2 = vld [vmem:[#allocation7 + $0x38] sm:$0xff]  ;;  %v1864_v3 = vcombine.low %v852_v62, %v856_v63  ;;  %v880_v58 = vld [vmem:[#allocation7 + $0xf0] sm:$0xff] }
  0x81   :  { %v1866_v4 = vcombine.low %v853_v0, %v857_v2  ;;  %v1867_v5 = vcombine.high %v853_v0, %v857_v2  ;;  %v888_v2 = vld [vmem:[#allocation7 + $0x130] sm:$0xff] }
  0x82   :  { %1279 = vmatpush1.bf16.msra.mxu0 %v1868_v6  ;;  %v2226_v6 = vmov 0  }
  0x83   :  { %1320 = vmatpush1.bf16.msra.mxu1 %v1870_v7  ;;  %1280 = vmatprep.subr.bf16.mxu0 %v1877_v8 }
  0x84   :  { %1321 = vmatprep.subr.bf16.mxu1 %v1879_v9  ;;  %1308 = vmatprep.mubr.bf16.mxu0 %v2226_v6  ;;  %v1795_v9 = vld [vmem:[%s2467_s2] ss:$0 sm:$0xff] }
  0x85   :  { %1349 = vmatprep.mubr.bf16.mxu1 %v2226_v6 }
  0x86   :  { %1281 = vmatpush1.bf16.msra.mxu0 %v1876_v14 }
  0x87   :  { %1322 = vmatpush1.bf16.msra.mxu1 %v1878_v15  ;;  %1282 = vmatprep.subr.bf16.mxu0 %v1885_v16 }
  0x88   :  { %1323 = vmatprep.subr.bf16.mxu1 %v1887_v17 }
  0x8a   :  { %1283 = vmatpush1.bf16.msra.mxu0 %v1884_v22 }
  0x8b   :  { %1324 = vmatpush1.bf16.msra.mxu1 %v1886_v23  ;;  %1284 = vmatprep.subr.bf16.mxu0 %v1893_v28 }
  0x8c   :  { %1325 = vmatprep.subr.bf16.mxu1 %v1895_v29 }
  0x8e   :  { %1285 = vmatpush1.bf16.msra.mxu0 %v1892_v35 }
  0x8f   :  { %1326 = vmatpush1.bf16.msra.mxu1 %v1894_v36  ;;  %1286 = vmatprep.subr.bf16.mxu0 %v1901_v42  ;;  %v860_v36 = vld [vmem:[#allocation7 + $0x50] sm:$0xff] }
  0x90   :  { %1327 = vmatprep.subr.bf16.mxu1 %v1903_v43  ;;  %v864_v42 = vld [vmem:[#allocation7 + $0x70] sm:$0xff]  ;;  %v861_v43 = vld [vmem:[#allocation7 + $0x58] sm:$0xff] }
  0x91   :  { %v1873_v47 = vcombine.high %v860_v36, %v864_v42 }
  0x92   :  { %1287 = vmatpush1.bf16.msra.mxu0 %v1900_v44  ;;  %v865_v44 = vld [vmem:[#allocation7 + $0x78] sm:$0xff] }
  0x93   :  { %1328 = vmatpush1.bf16.msra.mxu1 %v1902_v45  ;;  %1288 = vmatprep.subr.bf16.mxu0 %v1909_v49  ;;  %v1875_v48 = vcombine.high %v861_v43, %v865_v44  ;;  %v868_v49 = vld [vmem:[#allocation7 + $0x90] sm:$0xff]  ;;  %v1874_v54 = vcombine.low %v861_v43, %v865_v44 }
  0x94   :  { %1329 = vmatprep.subr.bf16.mxu1 %v1911_v53  ;;  %v1872_v53 = vcombine.low %v860_v36, %v864_v42  ;;  %v1881_v55 = vcombine.high %v868_v49, %v872_v50 }
  0x96   :  { %1289 = vmatpush1.bf16.msra.mxu0 %v1908_v51  ;;  %v869_v51 = vld [vmem:[#allocation7 + $0x98] sm:$0xff] }
  0x97   :  { %1330 = vmatpush1.bf16.msra.mxu1 %v1910_v52  ;;  %1290 = vmatprep.subr.bf16.mxu0 %v1917_v57  ;;  %v873_v52 = vld [vmem:[#allocation7 + $0xb8] sm:$0xff]  ;;  %v876_v57 = vld [vmem:[#allocation7 + $0xd0] sm:$0xff] }
  0x98   :  { %1331 = vmatprep.subr.bf16.mxu1 %v1919_v61  ;;  %v1883_v56 = vcombine.high %v869_v51, %v873_v52  ;;  %v1880_v61 = vcombine.low %v868_v49, %v872_v50  ;;  %v1882_v62 = vcombine.low %v869_v51, %v873_v52  ;;  %v1889_v63 = vcombine.high %v876_v57, %v880_v58 }
  0x99   :  { %v922_v49 = vsub.s32 1, %v2304_v32  ;;  %v930_v50 = vsub.s32 3, %v2304_v32 }
  0x9a   :  { %1291 = vmatpush1.bf16.msra.mxu0 %v1916_v59  ;;  %v877_v59 = vld [vmem:[#allocation7 + $0xd8] sm:$0xff] }
  0x9b   :  { %1332 = vmatpush1.bf16.msra.mxu1 %v1918_v60  ;;  %1358 = vmatprep.subr.bf16.mxu0 %v1865_v1  ;;  %v881_v60 = vld [vmem:[#allocation7 + $0xf8] sm:$0xff]  ;;  %v884_v1 = vld [vmem:[#allocation7 + $0x110] sm:$0xff] }
  0x9c   :  { %1399 = vmatprep.subr.bf16.mxu1 %v1867_v5  ;;  %v1891_v0 = vcombine.high %v877_v59, %v881_v60  ;;  %v1888_v5 = vcombine.low %v876_v57, %v880_v58 }
 0x130   :  { %v1940_v7 = vpop.f32.mrb[0].mxu0 }
 0x131   :  { %v1962_v8 = vpop.f32.mrb[0].mxu1  ;;  %v1941_v10 = vpop.f32.mrb[1].mxu0 }
 0x132   :  { %v1963_v11 = vpop.f32.mrb[1].mxu1  ;;  %v1942_v12 = vadd.f32 %v1941_v10, %v1940_v7  ;;  %v1943_v14 = vpop.f32.mrb[2].mxu0  ;;  %v1890_v7 = vcombine.low %v877_v59, %v881_v60  ;;  %v896_v10 = vld [vmem:[#allocation7 + $0x170] sm:$0xff] }
 0x133   :  { %v1964_v13 = vadd.f32 %v1963_v11, %v1962_v8  ;;  %v1965_v15 = vpop.f32.mrb[2].mxu1  ;;  %v1944_v16 = vpop.f32.mrb[3].mxu0  ;;  %v1897_v8 = vcombine.high %v884_v1, %v888_v2  ;;  %v893_v11 = vld [vmem:[#allocation7 + $0x158] sm:$0xff] }
 0x134   :  { %v1966_v17 = vpop.f32.mrb[3].mxu1  ;;  %v724_v18 = vadd.f32 %v1942_v12, %v1795_v9  ;;  %v892_v9 = vld [vmem:[#allocation7 + $0x150] sm:$0xff]  ;;  %v897_v12 = vld [vmem:[#allocation7 + $0x178] sm:$0xff] }
 0x135   :  { %v1905_v15 = vcombine.high %v892_v9, %v896_v10  ;;  %v1907_v16 = vcombine.high %v893_v11, %v897_v12  ;;  %v900_v17 = vld [vmem:[#allocation7 + $0x190] sm:$0xff] }
 0x136   :  { %v764_v19 = vadd.f32 %v1964_v13, %v724_v18  ;;  %v1896_v13 = vcombine.low %v884_v1, %v888_v2  ;;  %v904_v18 = vld [vmem:[#allocation7 + $0x1b0] sm:$0xff] }
 0x150   :  { %v1984_v20 = vpop.f32.mrb[4].mxu0 }
 0x151   :  { %v2006_v21 = vpop.f32.mrb[4].mxu1  ;;  %v1985_v22 = vpop.f32.mrb[5].mxu0 }
 0x152   :  { %v2007_v23 = vpop.f32.mrb[5].mxu1  ;;  %v1986_v28 = vadd.f32 %v1985_v22, %v1984_v20  ;;  %v1987_v30 = vpop.f32.mrb[6].mxu0  ;;  %v905_v20 = vld [vmem:[#allocation7 + $0x1b8] sm:$0xff]  ;;  %v1906_v22 = vcombine.low %v893_v11, %v897_v12 }
 0x153   :  { %v2008_v29 = vadd.f32 %v2007_v23, %v2006_v21  ;;  %v2009_v31 = vpop.f32.mrb[6].mxu1  ;;  %v1988_v33 = vpop.f32.mrb[7].mxu0  ;;  %v1904_v21 = vcombine.low %v892_v9, %v896_v10  ;;  %v1913_v23 = vcombine.high %v900_v17, %v904_v18  ;;  %v912_v30 = vld [vmem:[#allocation7 + $0x1f0] sm:$0xff] }
 0x154   :  { %v2010_v34 = vpop.f32.mrb[7].mxu1  ;;  %v804_v35 = vadd.f32 %v1986_v28, %v764_v19  ;;  %v901_v19 = vld [vmem:[#allocation7 + $0x198] sm:$0xff] }
 0x155   :  { %v1915_v28 = vcombine.high %v901_v19, %v905_v20  ;;  %v909_v31 = vld [vmem:[#allocation7 + $0x1d8] sm:$0xff]  ;;  %v1912_v34 = vcombine.low %v900_v17, %v904_v18 }
 0x156   :  { %v844_v45 = vadd.f32 %v2008_v29, %v804_v35  ;;  %v908_v29 = vld [vmem:[#allocation7 + $0x1d0] sm:$0xff]  ;;  %v913_v33 = vld [vmem:[#allocation7 + $0x1f8] sm:$0xff]  ;;  %v1914_v35 = vcombine.low %v901_v19, %v905_v20 }
 0x157   :  { %v1921_v36 = vcombine.high %v908_v29, %v912_v30  ;;  %v1923_v42 = vcombine.high %v909_v31, %v913_v33  ;;  %v1920_v43 = vcombine.low %v908_v29, %v912_v30  ;;  %v1922_v44 = vcombine.low %v909_v31, %v913_v33 }
 0x158   :  { %v2352_v46 = vpack.c.bf16 %v844_v45, %v844_v45  ;;  %v918_v45 = vsub.s32 0, %v2304_v32 }
 0x15a   :  { %1309 = vmatmul.mubr.bf16.vlgmr.msra.gmra.mrb[8].mxu0 %v2352_v46  ;;  %1350 = vmatmul.mubr.bf16.vlgmr.msra.gmra.mrb[8].mxu1 %v2352_v46 }
 0x15b   :  { %1359 = vmatpush1.bf16.msra.mxu0 %v1864_v3  ;;  %1400 = vmatpush1.bf16.msra.mxu1 %v1866_v4  ;;  %v885_v3 = vld [vmem:[#allocation7 + $0x118] sm:$0xff] }
 0x15c   :  { %1360 = vmatprep.subr.bf16.mxu0 %v1873_v47  ;;  %1401 = vmatprep.subr.bf16.mxu1 %v1875_v48  ;;  %v889_v4 = vld [vmem:[#allocation7 + $0x138] sm:$0xff]  ;;  %v926_v47 = vsub.s32 2, %v2304_v32  ;;  %v2363_v48 = vld [vmem:[%s2469_s4] sm:$0xff] }
 0x15d   :  { %1390 = vmatprep.mubr.bf16.mxu0 %v2226_v6  ;;  %1431 = vmatprep.mubr.bf16.mxu1 %v2226_v6  ;;  %v1899_v6 = vcombine.high %v885_v3, %v889_v4  ;;  %v1898_v14 = vcombine.low %v885_v3, %v889_v4  ;;  %v919_v51 = vrot.slane %v2363_v48, %v918_v45 }
 0x15e   :  { %v927_v52 = vrot.slane %v2363_v48, %v926_v47 }
 0x15f   :  { %1361 = vmatpush1.bf16.msra.mxu0 %v1872_v53  ;;  %1402 = vmatpush1.bf16.msra.mxu1 %v1874_v54  ;;  %v923_v53 = vrot.slane %v2363_v48, %v922_v49 }
 0x160   :  { %1362 = vmatprep.subr.bf16.mxu0 %v1881_v55  ;;  %1403 = vmatprep.subr.bf16.mxu1 %v1883_v56 }
 0x163   :  { %1363 = vmatpush1.bf16.msra.mxu0 %v1880_v61  ;;  %1404 = vmatpush1.bf16.msra.mxu1 %v1882_v62 }
 0x164   :  { %1364 = vmatprep.subr.bf16.mxu0 %v1889_v63  ;;  %1405 = vmatprep.subr.bf16.mxu1 %v1891_v0 }
 0x167   :  { %1365 = vmatpush1.bf16.msra.mxu0 %v1888_v5  ;;  %1406 = vmatpush1.bf16.msra.mxu1 %v1890_v7 }
 0x168   :  { %1366 = vmatprep.subr.bf16.mxu0 %v1897_v8  ;;  %1407 = vmatprep.subr.bf16.mxu1 %v1899_v6 }
 0x16b   :  { %1367 = vmatpush1.bf16.msra.mxu0 %v1896_v13  ;;  %1408 = vmatpush1.bf16.msra.mxu1 %v1898_v14 }
 0x16c   :  { %1368 = vmatprep.subr.bf16.mxu0 %v1905_v15  ;;  %1409 = vmatprep.subr.bf16.mxu1 %v1907_v16 }
 0x16f   :  { %1369 = vmatpush1.bf16.msra.mxu0 %v1904_v21  ;;  %1410 = vmatpush1.bf16.msra.mxu1 %v1906_v22 }
 0x170   :  { %1370 = vmatprep.subr.bf16.mxu0 %v1913_v23  ;;  %1411 = vmatprep.subr.bf16.mxu1 %v1915_v28 }
 0x173   :  { %1371 = vmatpush1.bf16.msra.mxu0 %v1912_v34  ;;  %1412 = vmatpush1.bf16.msra.mxu1 %v1914_v35 }
 0x174   :  { %1372 = vmatprep.subr.bf16.mxu0 %v1921_v36  ;;  %1413 = vmatprep.subr.bf16.mxu1 %v1923_v42 }
 0x177   :  { %1373 = vmatpush1.bf16.msra.mxu0 %v1920_v43  ;;  %1414 = vmatpush1.bf16.msra.mxu1 %v1922_v44 }
 0x17a   :  { %1391 = vmatmul.mubr.bf16.vlgmr.msra.gmra.mrb[12].mxu0 %v2352_v46  ;;  %1432 = vmatmul.mubr.bf16.vlgmr.msra.gmra.mrb[12].mxu1 %v2352_v46  ;;  %v931_v46 = vrot.slane %v2363_v48, %v930_v50  ;;  %v2227_v50 = vmov 1966171168  }
 0x22d   :  { %v1310_v54 = vpop.f32.mrb[8].mxu0  ;;  %v1351_v55 = vpop.f32.mrb[8].mxu1 }
 0x22e   :  { %v1311_v56 = vadd.f32 %v1310_v54, %v919_v51  ;;  %v1352_v57 = vadd.f32 %v1351_v55, %v927_v52  ;;  %v1312_v58 = vpop.f32.mrb[9].mxu0  ;;  %v1353_v59 = vpop.f32.mrb[9].mxu1  ;;  %v1717_v51 = vunpack.c.l.s4 %v2227_v50  ;;  %v934_v55 = vsub.s32 4, %v2304_v32 }
 0x22f   :  { %v1313_v60 = vadd.f32 %v1312_v58, %v923_v53  ;;  %v1354_v61 = vadd.f32 %v1353_v59, %v931_v46  ;;  %v1314_v62 = vpop.f32.mrb[10].mxu0  ;;  %v1355_v63 = vpop.f32.mrb[10].mxu1 }
 0x230   :  { %v1315_v0 = vpop.f32.mrb[11].mxu0  ;;  %v1356_v1 = vpop.f32.mrb[11].mxu1  ;;  %v938_v62 = vsub.s32 5, %v2304_v32  ;;  %v946_v63 = vsub.s32 7, %v2304_v32 }
 0x231   :  { %v1448_v2 = vcombine.low %v1311_v56, %v1313_v60  ;;  %v1449_v3 = vcombine.high %v1311_v56, %v1313_v60  ;;  %v1450_v4 = vcombine.low %v1352_v57, %v1354_v61  ;;  %v1451_v5 = vcombine.high %v1352_v57, %v1354_v61 }
 0x232   :  { %v942_v56 = vsub.s32 6, %v2304_v32  ;;  %v1718_v61 = vunpack.c.0.s8 %v1717_v51 }
 0x233   :  { %v1458_v7 = vrot.slane %v1448_v2, %v2307_v37  ;;  %v1465_v8 = vrot.slane %v1449_v3, %v2307_v37  ;;  %v1472_v6 = vrot.slane %v1450_v4, %v2307_v37  ;;  %v1479_v9 = vrot.slane %v1451_v5, %v2307_v37 }
 0x234   :  { %v935_v4 = vrot.slane %v2363_v48, %v934_v55  ;;  %v943_v5 = vrot.slane %v2363_v48, %v942_v56 }
 0x235   :  { %v1480_v10 = vcombine.low %v1458_v7, %v1472_v6  ;;  %v1481_v11 = vcombine.high %v1458_v7, %v1472_v6  ;;  %v1482_v12 = vcombine.low %v1465_v8, %v1479_v9  ;;  %v1483_v13 = vcombine.high %v1465_v8, %v1479_v9 }
 0x237   :  { %1528 = vst [vmem:[#allocation8] sm:$0xff] %v1480_v10  ;;  %1530 = vst [vmem:[#allocation8 + $0x10] sm:$0xff] %v1481_v11  ;;  %v1536_v14 = vsub.f32 %v2309_v38, %v1480_v10  ;;  %v1538_v15 = vsub.f32 %v2311_v39, %v1481_v11  ;;  %v1540_v16 = vsub.f32 %v2313_v40, %v1482_v12 }
 0x238   :  { %1532 = vst [vmem:[#allocation8 + $0x20] sm:$0xff] %v1482_v12  ;;  %1534 = vst [vmem:[#allocation8 + $0x30] sm:$0xff] %v1483_v13  ;;  %v1542_v17 = vsub.f32 %v2315_v41, %v1483_v13  ;;  %v2399_v10 = vsub.s32 %v1718_v61, %v2304_v32  ;;  %v939_v11 = vrot.slane %v2363_v48, %v938_v62 }
 0x239   :  { %v1544_v18 = vmul.f32 %v1536_v14, %v1536_v14  ;;  %v1546_v19 = vmul.f32 %v1538_v15, %v1538_v15  ;;  %v1548_v20 = vmul.f32 %v1540_v16, %v1540_v16  ;;  %v947_v12 = vrot.slane %v2363_v48, %v946_v63 }
 0x23a   :  { %v1550_v21 = vmul.f32 %v1542_v17, %v1542_v17 }
 0x23b   :  { %v1568_v22 = vcombine.low %v1544_v18, %v1546_v19  ;;  %v1569_v23 = vcombine.high %v1544_v18, %v1546_v19 }
 0x23c   :  { %v1570_v28 = vcombine.low %v1548_v20, %v1550_v21  ;;  %v1571_v29 = vcombine.high %v1548_v20, %v1550_v21 }
 0x23d   :  { %v1578_v30 = vrot.slane %v1568_v22, %v2307_v37  ;;  %v1585_v31 = vrot.slane %v1569_v23, %v2307_v37 }
 0x23e   :  { %v1592_v38 = vrot.slane %v1570_v28, %v2307_v37  ;;  %v1599_v39 = vrot.slane %v1571_v29, %v2307_v37 }
 0x240   :  { %v1600_v40 = vcombine.low %v1578_v30, %v1592_v38  ;;  %v1601_v41 = vcombine.high %v1578_v30, %v1592_v38  ;;  %v1602_v33 = vcombine.low %v1585_v31, %v1599_v39  ;;  %v1603_v34 = vcombine.high %v1585_v31, %v1599_v39 }
 0x242   :  { %v1648_v35 = vsel %vm1557_vm0, %v1600_v40, 0.0  ;;  %v1649_v36 = vsel %vm1557_vm0, %v1601_v41, 0.0  ;;  %v1650_v42 = vsel %vm1557_vm0, %v1602_v33, 0.0  ;;  %v1651_v43 = vsel %vm1557_vm0, %v1603_v34, 0.0 }
 0x243   :  { %v1656_v44 = vrot.slane %v1648_v35, 4  ;;  %v1662_v45 = vrot.slane %v1649_v36, 4  ;;  %v1668_v47 = vrot.slane %v1650_v42, 4  ;;  %v1674_v49 = vrot.slane %v1651_v43, 4 }
 0x245   :  { %v1657_v52 = vadd.f32 %v1656_v44, %v1648_v35  ;;  %v1663_v53 = vadd.f32 %v1662_v45, %v1649_v36  ;;  %v1669_v46 = vadd.f32 %v1668_v47, %v1650_v42  ;;  %v1675_v54 = vadd.f32 %v1674_v49, %v1651_v43 }
 0x247   :  { %v1658_v57 = vrot.slane %v1657_v52, 2  ;;  %v1664_v58 = vrot.slane %v1663_v53, 2  ;;  %v1670_v59 = vrot.slane %v1669_v46, 2  ;;  %v1676_v60 = vrot.slane %v1675_v54, 2 }
 0x249   :  { %v1659_v0 = vadd.f32 %v1658_v57, %v1657_v52  ;;  %v1665_v1 = vadd.f32 %v1664_v58, %v1663_v53  ;;  %v1671_v2 = vadd.f32 %v1670_v59, %v1669_v46  ;;  %v1677_v3 = vadd.f32 %v1676_v60, %v1675_v54 }
 0x24b   :  { %v1660_v7 = vrot.slane %v1659_v0, 1  ;;  %v1666_v8 = vrot.slane %v1665_v1, 1  ;;  %v1672_v6 = vrot.slane %v1671_v2, 1  ;;  %v1678_v9 = vrot.slane %v1677_v3, 1 }
 0x24d   :  { %v1661_v13 = vadd.f32 %v1660_v7, %v1659_v0  ;;  %v1667_v14 = vadd.f32 %v1666_v8, %v1665_v1  ;;  %v1673_v15 = vadd.f32 %v1672_v6, %v1671_v2  ;;  %v1679_v16 = vadd.f32 %v1678_v9, %v1677_v3  ;;  %v1392_v17 = vpop.f32.mrb[12].mxu0  ;;  %v1433_v18 = vpop.f32.mrb[12].mxu1 }
 0x24e   :  { %v1393_v21 = vadd.f32 %v1392_v17, %v935_v4  ;;  %v1434_v22 = vadd.f32 %v1433_v18, %v943_v5  ;;  %v1394_v23 = vpop.f32.mrb[13].mxu0  ;;  %v1435_v28 = vpop.f32.mrb[13].mxu1 }
 0x24f   :  { %v1712_v19 = vcombine.low %v1661_v13, %v1667_v14  ;;  %v1713_v20 = vcombine.low %v1673_v15, %v1679_v16  ;;  %v1395_v29 = vadd.f32 %v1394_v23, %v939_v11  ;;  %v1436_v30 = vadd.f32 %v1435_v28, %v947_v12  ;;  %v1396_v31 = vpop.f32.mrb[14].mxu0  ;;  %v1437_v38 = vpop.f32.mrb[14].mxu1 }
 0x250   :  { %v1397_v40 = vpop.f32.mrb[15].mxu0  ;;  %v1438_v41 = vpop.f32.mrb[15].mxu1 }
 0x251   :  { %v2404_v39 = vrot.slane %v1712_v19, %v2399_v10  ;;  %v2407_v48 = vrot.slane %v1713_v20, %v2399_v10  ;;  %v1484_v33 = vcombine.low %v1393_v21, %v1395_v29  ;;  %v1485_v34 = vcombine.high %v1393_v21, %v1395_v29 }
 0x252   :  { %v1486_v35 = vcombine.low %v1434_v22, %v1436_v30  ;;  %v1487_v36 = vcombine.high %v1434_v22, %v1436_v30 }
 0x253   :  { %v1744_v42 = vcombine.low %v2404_v39, %v2407_v48  ;;  %v1494_v43 = vrot.slane %v1484_v33, %v2307_v37  ;;  %v1501_v44 = vrot.slane %v1485_v34, %v2307_v37 }
 0x254   :  { %v1508_v45 = vrot.slane %v1486_v35, %v2307_v37  ;;  %v1515_v47 = vrot.slane %v1487_v36, %v2307_v37 }
 0x256   :  { %v1516_v49 = vcombine.low %v1494_v43, %v1508_v45  ;;  %v1517_v50 = vcombine.high %v1494_v43, %v1508_v45  ;;  %v1518_v51 = vcombine.low %v1501_v44, %v1515_v47  ;;  %v1519_v52 = vcombine.high %v1501_v44, %v1515_v47 }
 0x257   :  { %v1752_v44 = vrot.slane %v1744_v42, %v2399_v10 }
 0x258   :  { %1529 = vst [vmem:[#allocation8 + $0x8] sm:$0xff] %v1516_v49  ;;  %1531 = vst [vmem:[#allocation8 + $0x18] sm:$0xff] %v1517_v50  ;;  %v1537_v53 = vsub.f32 %v2329_v24, %v1516_v49  ;;  %v1539_v46 = vsub.f32 %v2331_v25, %v1517_v50  ;;  %v1541_v54 = vsub.f32 %v2333_v26, %v1518_v51 }
 0x259   :  { %1533 = vst [vmem:[#allocation8 + $0x28] sm:$0xff] %v1518_v51  ;;  %1535 = vst [vmem:[#allocation8 + $0x38] sm:$0xff] %v1519_v52  ;;  %v1543_v55 = vsub.f32 %v2335_v27, %v1519_v52 }
 0x25a   :  { %v1545_v56 = vmul.f32 %v1537_v53, %v1537_v53  ;;  %v1547_v57 = vmul.f32 %v1539_v46, %v1539_v46  ;;  %v1549_v58 = vmul.f32 %v1541_v54, %v1541_v54 }
 0x25b   :  { %v1551_v59 = vmul.f32 %v1543_v55, %v1543_v55 }
 0x25c   :  { %v1604_v60 = vcombine.low %v1545_v56, %v1547_v57  ;;  %v1605_v61 = vcombine.high %v1545_v56, %v1547_v57 }
 0x25d   :  { %v1606_v62 = vcombine.low %v1549_v58, %v1551_v59  ;;  %v1607_v63 = vcombine.high %v1549_v58, %v1551_v59 }
 0x25e   :  { %v1614_v0 = vrot.slane %v1604_v60, %v2307_v37  ;;  %v1621_v1 = vrot.slane %v1605_v61, %v2307_v37 }
 0x25f   :  { %v1628_v24 = vrot.slane %v1606_v62, %v2307_v37  ;;  %v1635_v25 = vrot.slane %v1607_v63, %v2307_v37 }
 0x261   :  { %v1636_v2 = vcombine.low %v1614_v0, %v1628_v24  ;;  %v1637_v26 = vcombine.high %v1614_v0, %v1628_v24  ;;  %v1638_v3 = vcombine.low %v1621_v1, %v1635_v25  ;;  %v1639_v27 = vcombine.high %v1621_v1, %v1635_v25 }
 0x263   :  { %v1652_v4 = vsel %vm1557_vm0, %v1636_v2, 0.0  ;;  %v1653_v5 = vsel %vm1557_vm0, %v1637_v26, 0.0  ;;  %v1654_v7 = vsel %vm1557_vm0, %v1638_v3, 0.0  ;;  %v1655_v8 = vsel %vm1557_vm0, %v1639_v27, 0.0 }
 0x264   :  { %v1680_v6 = vrot.slane %v1652_v4, 4  ;;  %v1686_v9 = vrot.slane %v1653_v5, 4  ;;  %v1692_v11 = vrot.slane %v1654_v7, 4  ;;  %v1698_v37 = vrot.slane %v1655_v8, 4 }
 0x266   :  { %v1681_v12 = vadd.f32 %v1680_v6, %v1652_v4  ;;  %v1687_v13 = vadd.f32 %v1686_v9, %v1653_v5  ;;  %v1693_v14 = vadd.f32 %v1692_v11, %v1654_v7  ;;  %v1699_v15 = vadd.f32 %v1698_v37, %v1655_v8 }
 0x268   :  { %v1682_v16 = vrot.slane %v1681_v12, 2  ;;  %v1688_v17 = vrot.slane %v1687_v13, 2  ;;  %v1694_v18 = vrot.slane %v1693_v14, 2  ;;  %v1700_v19 = vrot.slane %v1699_v15, 2 }
 0x26a   :  { %v1683_v20 = vadd.f32 %v1682_v16, %v1681_v12  ;;  %v1689_v21 = vadd.f32 %v1688_v17, %v1687_v13  ;;  %v1695_v22 = vadd.f32 %v1694_v18, %v1693_v14  ;;  %v1701_v23 = vadd.f32 %v1700_v19, %v1699_v15 }
 0x26c   :  { %v1684_v28 = vrot.slane %v1683_v20, 1  ;;  %v1690_v29 = vrot.slane %v1689_v21, 1  ;;  %v1696_v32 = vrot.slane %v1695_v22, 1  ;;  %v1702_v30 = vrot.slane %v1701_v23, 1 }
 0x26e   :  { %v1685_v31 = vadd.f32 %v1684_v28, %v1683_v20  ;;  %v1691_v38 = vadd.f32 %v1690_v29, %v1689_v21  ;;  %v1697_v40 = vadd.f32 %v1696_v32, %v1695_v22  ;;  %v1703_v41 = vadd.f32 %v1702_v30, %v1701_v23 }
 0x270   :  { %v1714_v33 = vcombine.low %v1685_v31, %v1691_v38  ;;  %v1715_v34 = vcombine.low %v1697_v40, %v1703_v41 }
 0x272   :  { %v1736_v35 = vrot.slane %v1714_v33, %v2399_v10  ;;  %v1743_v36 = vrot.slane %v1715_v34, %v2399_v10 }
 0x274   :  { %v1745_v43 = vcombine.low %v1736_v35, %v1743_v36 }
 0x276   :  { %v1759_v45 = vrot.slane %v1745_v43, %v2399_v10 }
 0x278   :  { %v1760_v47 = vcombine.low %v1752_v44, %v1759_v45 }
 0x27a   :  { %1762 = vst [vmem:[#allocation9] sm:$0xff] %v1760_v47 }
 0x27b   :  { %1767 = vsyncadd [#allocation4], 768  ;;  %s2228_s4 = smov [#allocation8]   ;;  %s2229_s17 = smov [#allocation9]  }
 0x27c   :  { %s1768_s16 = sshll.u32 %s2228_s4, 4  ;;  %s1781_s18 = sshll.u32 %s2229_s17, 4  ;;  %s1769_s16 = int_to_ptr.vmem [resolvable:$true] %s1768_s16  ;;  %s1782_s18 = int_to_ptr.vmem [resolvable:$true] %s1781_s18 }
 0x27d   :  { %s2164_s19 = scalar_lea.vmem %s1769_s16, 256  ;;  %s2168_s20 = scalar_lea.vmem %s1769_s16, 1024 }
 0x27e   :  { %p2165_p10 = scmp.ne.s32.totalorder %s1769_s16, %s2164_s19  ;;  %p2169_p11 = scmp.lt.s32.totalorder %s1769_s16, %s1769_s16 }
 0x27f   :  { %p2170_p12 = scmp.lt.s32.totalorder %s2168_s20, %s2164_s19 }
 0x281   :  { %p2171_p13 = por %p2170_p12, %p2169_p11 }
 0x283   :  { %p2172_p0 = pnand %p2171_p13, %p2165_p10 }
 0x285   :  { %2175 = shalt.err (!%p2172_p0)
}
 0x286   :  { %s2176_s24 = scalar_lea.hbm %s2470_s5, 256 }
 0x287   :  { %p2177_p1 = scmp.ne.s32.totalorder %s2470_s5, %s2176_s24  ;;  %p2180_p2 = scmp.lt.u32.totalorder %s2176_s24, %s2470_s5 }
 0x289   :  { %p2182_p3 = pnand %p2180_p2, %p2177_p1 }
 0x28b   :  { %2185 = shalt.err (!%p2182_p3)
}
 0x28c   :  { %1774 = dma.vmem_to_hbm [thread:$0]  %s1769_s16, 256, %s2470_s5, [#allocation4], %s2220_s21, %s2220_s21, %s2221_s22  }
 0x28d   :  { %s2186_s7 = scalar_lea.vmem %s1782_s18, 128  ;;  %p2191_p5 = scmp.lt.s32.totalorder %s1782_s18, %s1782_s18 }
 0x28e   :  { %p2187_p4 = scmp.ne.s32.totalorder %s1782_s18, %s2186_s7  ;;  %p2192_p6 = scmp.lt.s32.totalorder %s2186_s7, %s2186_s7 }
 0x290   :  { %p2193_p7 = por %p2192_p6, %p2191_p5 }
 0x292   :  { %p2194_p8 = pnand %p2193_p7, %p2187_p4 }
 0x294   :  { %2197 = shalt.err (!%p2194_p8)
}
 0x295   :  { %s2198_s10 = scalar_lea.hbm %s2471_s6, 128 }
 0x296   :  { %p2199_p9 = scmp.ne.s32.totalorder %s2471_s6, %s2198_s10  ;;  %p2202_p10 = scmp.lt.u32.totalorder %s2198_s10, %s2471_s6 }
 0x298   :  { %p2204_p11 = pnand %p2202_p10, %p2199_p9 }
 0x29a   :  { %2207 = shalt.err (!%p2204_p11)
}
 0x29b   :  { %1784 = dma.vmem_to_hbm [thread:$0]  %s1782_s18, 128, %s2471_s6, [#allocation10]  }
 0x29c   :  { %2212 = dma.done.wait [#allocation4], 1024  }
 0x29d   :  { %2213 = vsyncadd [#allocation4], 4294966272 }
 0x29e   :  { %2214 = dma.done.wait [#allocation10], 128  }
 0x29f   :  { %2215 = vsyncadd [#allocation10], 4294967168 }
 0x2a0   :  { %1791 = vsyncpa [#allocation3], 1 }
 0x2a1   :  { %1792 = vsyncpa [#allocation6], 1 }
 0x2a2   :  { %1793 = vsyncpa [#allocation4], 1 }
 0x2a3   :  { %1794 = vsyncpa [#allocation10], 1 }

</bundles_post_ra>
